<compile_context>
chip_gen: v7x
topology: tpu7x:2x2x1
jax: 0.10.0
libtpu: 0.0.40
codegen_flags: <defaults>
</compile_context>

<pallas_src>
import functools

import jax
import jax.numpy as jnp
from jax.experimental import pallas as pl
from jax.experimental.pallas import tpu as pltpu


# --------------------------------------------------------------------------- #
# Kernel
# --------------------------------------------------------------------------- #
def _colbert_scores_kernel(sel_ref, q_ref, d_ref, out_ref, mx_ref):
    # sel_ref: (G, TQ)  f32 block-diagonal query-token -> query-batch selector
    # q_ref:   (TQ, Dp) matmul dtype (G whole query batches of Nq tokens)
    # d_ref:   (Sp, Dp) matmul dtype (doc tokens of candidate c)
    # out_ref: (G, B)   f32 score rows for these G queries; resident across c
    # mx_ref:  (B, TQ)  f32 scratch holding per-candidate row maxima
    c = pl.program_id(1)

    # Similarity tile on the MXU, native-dtype operands, f32 accumulation.
    sim = jax.lax.dot_general(
        q_ref[...], d_ref[...],
        dimension_numbers=(((1,), (1,)), ((), ())),
        preferred_element_type=jnp.float32,
    )  # (TQ, Sp)

    # Per-query-token max over candidate c's doc tokens (padded doc rows are
    # replicated real tokens, so no mask is needed).  Direct row write into
    # the scratch: no read-modify-write, no zero init.
    mx_ref[c, :] = jnp.max(sim, axis=1)

    # Once per q-tile row: ONE deferred segmented-sum matmul
    #   sel (G, TQ) x mx (B, TQ)^T -> (G, B), and a single output write.
    @pl.when(c == pl.num_programs(1) - 1)
    def _finalize():
        out_ref[...] = jax.lax.dot_general(
            sel_ref[...], mx_ref[...],
            dimension_numbers=(((1,), (1,)), ((), ())),
            preferred_element_type=jnp.float32,
        )


# --------------------------------------------------------------------------- #
# Wrapper helpers
# --------------------------------------------------------------------------- #
def _round_up(x, m):
    return (x + m - 1) // m * m


def _tpu_generation():
    """(per-core VMEM capacity bytes, chip has multiple TensorCores)."""
    vmem_cap = 64 << 20                      # conservative fallback
    try:
        vmem_cap = int(pltpu.get_tpu_info().vmem_capacity_bytes)
    except Exception:
        pass
    kind = ""
    try:
        kind = jax.devices()[0].device_kind.lower()
    except Exception:
        pass
    multi_core = ("v7" in kind) or (vmem_cap <= (64 << 20))
    return vmem_cap, multi_core


def _legal_query_tiles(B):
    """G must divide B, and be a multiple of 8 unless it equals B."""
    tiles = {B}
    for g in range(8, B, 8):
        if B % g == 0:
            tiles.add(g)
    return tiles


def _choose_queries_per_tile(B, Nq, Sp, Dp, in_itemsize, *, vmem_budget,
                             prefer_split):
    """Whole query batches handled per grid step (largest that fits VMEM)."""

    def footprint(g):
        tq = g * Nq
        return (2 * tq * Dp * in_itemsize      # double-buffered q tile
                + 2 * Sp * Dp * in_itemsize    # double-buffered d tile
                + 2 * g * tq * 4               # resident selector input (f32)
                + B * tq * 4                   # (B, TQ) row-max scratch
                + tq * Sp * 4                  # f32 similarity intermediate
                + 2 * g * B * 4)               # output block

    legal = _legal_query_tiles(B)
    order = sorted(legal, reverse=True)
    if prefer_split and any(g < B for g in legal):
        # Multi-TensorCore chip (v7x): keep >=2 blocks on the parallel axis.
        order = [g for g in order if g < B] + [B]
    for g in order:
        if footprint(g) <= vmem_budget:
            return g
    # Graceful fallback: the smallest-footprint legal tiling (never a blind B).
    return min(legal, key=footprint)


# --------------------------------------------------------------------------- #
# Public entry point
# --------------------------------------------------------------------------- #
@functools.partial(jax.jit, static_argnames=("matmul_dtype",))
def colbert_pairwise_ce_loss(query_embeddings, doc_embeddings,
                             matmul_dtype=jnp.bfloat16):
    B, Nq, D = query_embeddings.shape
    Bc, Ns, Dd = doc_embeddings.shape
    assert B == Bc and D == Dd, "batch / dim mismatch"

    q, d = query_embeddings, doc_embeddings
    if matmul_dtype is not None and q.dtype != matmul_dtype:
        # MXU-native dtype (numerics tradeoff; pass matmul_dtype=None to skip).
        q = q.astype(matmul_dtype)
        d = d.astype(matmul_dtype)

    # Lane padding of the contraction dim with zeros (exact for dot products).
    Dp = _round_up(D, 128)
    if Dp != D:
        q = jnp.pad(q, ((0, 0), (0, 0), (0, Dp - D)))
        d = jnp.pad(d, ((0, 0), (0, 0), (0, Dp - D)))

    # Doc-token padding by replicating a real token ("edge"): exact for the
    # max, so the kernel needs no padding mask.  Go lane-dense (128) only when
    # the extra rows are cheap (<~12.5% of Ns).
    Sp8, Sp128 = _round_up(Ns, 8), _round_up(Ns, 128)
    Sp = Sp128 if (Sp128 - Ns) <= Ns // 8 else Sp8
    if Sp != Ns:
        d = jnp.pad(d, ((0, 0), (0, Sp - Ns), (0, 0)), mode="edge")

    q2 = q.reshape(B * Nq, Dp)            # layout-trivial reshapes
    d2 = d.reshape(B * Sp, Dp)

    # Generation-aware sizing (v7x: 64 MiB VMEM / 2 TCs; v5e/v6e: 128 MiB).
    vmem_cap, multi_core = _tpu_generation()
    small_vmem = vmem_cap <= (64 << 20)
    vmem_budget = (18 << 20) if small_vmem else (64 << 20)
    vmem_limit = (44 << 20) if small_vmem else (96 << 20)

    G = _choose_queries_per_tile(B, Nq, Sp, Dp, q2.dtype.itemsize,
                                 vmem_budget=vmem_budget,
                                 prefer_split=multi_core)
    TQ = G * Nq
    num_q_tiles = B // G

    # Block-diagonal selector (G, TQ): sel[g, t] = 1 iff t // Nq == g.
    # Precomputed once, resident in VMEM (constant index_map -> fetched once).
    sel = (jnp.arange(TQ, dtype=jnp.int32)[None, :] // Nq
           == jnp.arange(G, dtype=jnp.int32)[:, None]).astype(jnp.float32)

    cost = pl.CostEstimate(
        flops=2 * (B * Nq) * Dp * (B * Sp)            # similarity matmuls
              + 2 * num_q_tiles * G * TQ * B,          # deferred selector matmuls
        transcendentals=0,
        bytes_accessed=(q2.size * q2.dtype.itemsize
                        + num_q_tiles * d2.size * d2.dtype.itemsize
                        + sel.size * sel.dtype.itemsize
                        + B * B * 4),
    )

    scores = pl.pallas_call(
        _colbert_scores_kernel,
        out_shape=jax.ShapeDtypeStruct((B, B), jnp.float32),
        grid=(num_q_tiles, B),
        in_specs=[
            pl.BlockSpec((G, TQ), lambda i, c: (0, 0)),     # selector (resident)
            pl.BlockSpec((TQ, Dp), lambda i, c: (i, 0)),    # query tile
            pl.BlockSpec((Sp, Dp), lambda i, c: (c, 0)),    # candidate doc tokens
        ],
        out_specs=pl.BlockSpec((G, B), lambda i, c: (i, 0)),  # resident across c
        scratch_shapes=[pltpu.VMEM((B, TQ), jnp.float32)],
        compiler_params=pltpu.CompilerParams(
            dimension_semantics=("parallel", "arbitrary"),
            vmem_limit_bytes=vmem_limit,
        ),
        cost_estimate=cost,
    )(sel, q2, d2)

    # Tiny epilogue in plain JAX; matches the PyTorch module exactly.
    pos = jnp.diagonal(scores)
    neg = jnp.max(scores - jnp.eye(B, dtype=scores.dtype) * 1e6, axis=1)
    return jnp.mean(jax.nn.softplus(neg - pos))


# --------------------------------------------------------------------------- #
# Reference + self-test
# --------------------------------------------------------------------------- #
def _reference_loss(q, d, matmul_dtype=None):
    if matmul_dtype is not None:
        q = q.astype(matmul_dtype)
        d = d.astype(matmul_dtype)
    sim = jnp.einsum("bnd,csd->bcns", q, d, preferred_element_type=jnp.float32)
    scores = sim.max(axis=3).sum(axis=2)
    pos = jnp.diagonal(scores)
    neg = jnp.max(scores - jnp.eye(scores.shape[0], dtype=scores.dtype) * 1e6,
                  axis=1)
    return jnp.mean(jax.nn.softplus(neg - pos))


if __name__ == "__main__":
    key = jax.random.PRNGKey(0)
    kq, kd = jax.random.split(key)

    B, Nq, Ns, D = 4, 8, 16, 32   # batch, query tokens, doc tokens, hidden
    q = jax.random.normal(kq, (B, Nq, D), dtype=jnp.float32)
    d = jax.random.normal(kd, (B, Ns, D), dtype=jnp.float32)

    loss = colbert_pairwise_ce_loss(q, d)
    jax.block_until_ready(loss)

    # Exact check against a reference using the same bf16 matmul precision.
    ref_matched = _reference_loss(q, d, matmul_dtype=jnp.bfloat16)
    assert jnp.allclose(loss, ref_matched, atol=2e-3, rtol=2e-3), (
        float(loss), float(ref_matched))

    # Loose semantic check against the full-f32 PyTorch-equivalent reference.
    ref_f32 = _reference_loss(q, d)
    assert jnp.allclose(loss, ref_f32, atol=0.5, rtol=0.1), (
        float(loss), float(ref_f32))

    print("KERNEL_OK")
</pallas_src>

<mosaic_0001>
module attributes {stable_mosaic.version = 11 : i64} {
  func.func @_colbert_scores_kernel(%arg0: i32, %arg1: i32, %arg2: memref<4x32xf32, #tpu.memory_space<vmem>>, %arg3: memref<32x128xbf16, #tpu.memory_space<vmem>>, %arg4: memref<16x128xbf16, #tpu.memory_space<vmem>>, %arg5: memref<4x4xf32, #tpu.memory_space<vmem>>, %arg6: memref<4x32xf32, #tpu.memory_space<vmem>>) attributes {dimension_semantics = [#tpu.dimension_semantics<parallel>, #tpu.dimension_semantics<arbitrary>], iteration_bounds = array<i64: 1, 4>, scalar_prefetch = 0 : i64, scratch_operands = 1 : i64, tpu.core_type = #tpu.core_type<tc>, window_params = [{pipeline_mode = #tpu.pipeline_mode<synchronous>, transform_indices = @transform_0, window_bounds = array<i64: 4, 32>}, {transform_indices = @transform_1, window_bounds = array<i64: 32, 128>}, {transform_indices = @transform_2, window_bounds = array<i64: 16, 128>}, {transform_indices = @transform_3, window_bounds = array<i64: 4, 4>}]} {
    %c0 = arith.constant 0 : index
    %c0_0 = arith.constant 0 : index
    %0 = vector.load %arg3[%c0, %c0_0] : memref<32x128xbf16, #tpu.memory_space<vmem>>, vector<32x128xbf16>
    %c0_1 = arith.constant 0 : index
    %c0_2 = arith.constant 0 : index
    %1 = vector.load %arg4[%c0_1, %c0_2] : memref<16x128xbf16, #tpu.memory_space<vmem>>, vector<16x128xbf16>
    %cst = arith.constant dense<0.000000e+00> : vector<32x16xf32>
    %2 = tpu.matmul %0, %1, %cst {dimension_numbers = #tpu.dot_dimension_numbers<[1], [1], [0], [0], [0, 0, 1, 0], [], []>} : vector<32x128xbf16>, vector<16x128xbf16>, vector<32x16xf32> -> vector<32x16xf32>
    %cst_3 = arith.constant dense<0xFF800000> : vector<32xf32>
    %3 = vector.multi_reduction <maximumf>, %2, %cst_3 [1] : vector<32x16xf32> to vector<32xf32>
    %4 = arith.index_cast %arg1 : i32 to index
    %c0_4 = arith.constant 0 : index
    %5 = vector.load %arg6[%4, %c0_4] : memref<4x32xf32, #tpu.memory_space<vmem>>, vector<1x32xf32>
    %6 = vector.shape_cast %5 : vector<1x32xf32> to vector<32xf32>
    %7 = vector.shape_cast %3 : vector<32xf32> to vector<1x32xf32>
    tpu.vector_store %arg6[%4, %c0_4], %7 {strides = array<i32>} : memref<4x32xf32, #tpu.memory_space<vmem>>, vector<1x32xf32>,
    %c3_i32 = arith.constant 3 : i32
    %8 = arith.cmpi eq, %arg1, %c3_i32 : i32
    %9 = arith.extui %8 : i1 to i32
    %c0_i32 = arith.constant 0 : i32
    %10 = arith.cmpi ne, %9, %c0_i32 : i32
    scf.if %10 {
      %c0_5 = arith.constant 0 : index
      %c0_6 = arith.constant 0 : index
      %11 = vector.load %arg2[%c0_5, %c0_6] : memref<4x32xf32, #tpu.memory_space<vmem>>, vector<4x32xf32>
      %c0_7 = arith.constant 0 : index
      %c0_8 = arith.constant 0 : index
      %12 = vector.load %arg6[%c0_7, %c0_8] : memref<4x32xf32, #tpu.memory_space<vmem>>, vector<4x32xf32>
      %cst_9 = arith.constant dense<0.000000e+00> : vector<4x4xf32>
      %13 = tpu.matmul %11, %12, %cst_9 {dimension_numbers = #tpu.dot_dimension_numbers<[1], [1], [0], [0], [0, 0, 1, 0], [], []>} : vector<4x32xf32>, vector<4x32xf32>, vector<4x4xf32> -> vector<4x4xf32>
      %c0_10 = arith.constant 0 : index
      %c0_11 = arith.constant 0 : index
      %14 = vector.load %arg5[%c0_10, %c0_11] : memref<4x4xf32, #tpu.memory_space<vmem>>, vector<4x4xf32>
      tpu.vector_store %arg5[%c0_10, %c0_11], %13 {strides = array<i32>} : memref<4x4xf32, #tpu.memory_space<vmem>>, vector<4x4xf32>,
    } else {
    }
    return
  }
  func.func @transform_0(%arg0: i32, %arg1: i32) -> (i32, i32) {
    %c0_i32 = arith.constant 0 : i32
    %c0_i32_0 = arith.constant 0 : i32
    %c0_i32_1 = arith.constant 0 : i32
    return %c0_i32, %c0_i32_0 : i32, i32
  }
  func.func @transform_1(%arg0: i32, %arg1: i32) -> (i32, i32) {
    %c0_i32 = arith.constant 0 : i32
    %c0_i32_0 = arith.constant 0 : i32
    return %arg0, %c0_i32 : i32, i32
  }
  func.func @transform_2(%arg0: i32, %arg1: i32) -> (i32, i32) {
    %c0_i32 = arith.constant 0 : i32
    %c0_i32_0 = arith.constant 0 : i32
    return %arg1, %c0_i32 : i32, i32
  }
  func.func @transform_3(%arg0: i32, %arg1: i32) -> (i32, i32) {
    %c0_i32 = arith.constant 0 : i32
    %c0_i32_0 = arith.constant 0 : i32
    return %arg0, %c0_i32 : i32, i32
  }
}

</mosaic_0001>

<bundles_post_ra>
// kernel: colbert_pairwise_ce_loss.1
= control target key start
LH: loop header
LB: loop body
LE: loop exit
PB: predicated region body
PF: predicated region fallthrough
CT: control target
= control target key end

     0   :  { %s594_s12 = smov 0   ;;  %s596_s13 = smov 0   ;;  %s641_s0 = inlined_call_operand.vmem [shape: f32[4,32], index: 0, kind: input, shape index: {}]   ;;  %s642_s1 = inlined_call_operand.vmem [shape: bf16[32,128], index: 1, kind: input, shape index: {}]   ;;  %s643_s2 = inlined_call_operand.vmem [shape: bf16[64,128], index: 2, kind: input, shape index: {}]   ;;  %s644_s3 = inlined_call_operand.vmem [shape: f32[4,4], index: 3, kind: output, shape index: {}]  }
   0x1   :  { %s598_s14 = smov 0  }
   0x2 LB: > { %s22_s15 = sadd.s32 1, %s566_s13  ;;  %p491_p0 = scmp.ge.s32.totalorder %s570_s14, 1  ;;  %s570_s14 = sphi %s598_s14, %s13_s14   ;;  %s566_s13 = sphi %s596_s13, %s646_s13   ;;  %s562_s12 = sphi %s594_s12, %s645_s12  }
   0x3   : > { %p23_p1 = scmp.ge.s32.totalorder %s22_s15, 4  ;;  %p161_p2 = scmp.lt.s32.totalorder %s570_s14, 5 }
   0x5   : > { %s648_s15 = smov (%p23_p1, %s22_s15), 0  ;;  %p162_p3 = pnand %p491_p0, %p161_p2 }
   0x6   : > { %s492_s16 = sshll.u32 (!%p162_p3), %s562_s12, 1  ;;  %v546_v0 = vld [vmem:[%s642_s1] sm:$0xff] (!%p162_p3)   ;;  %v547_v2 = vld [vmem:[%s642_s1 + $0x8] sm:$0xff] (!%p162_p3)   ;;  %vm279_vm0 = vcmask (!%p162_p3), 130048   ;;  %v296_v11 = vlaneseq (!%p162_p3)  ;;  %vm307_vm1 = vcmask (!%p162_p3), 130112   ;;  %vm314_vm2 = vcmask (!%p162_p3), 195712  }
   0x7   : > { %165 = sbr.rel (%p162_p3) target bundleno = 615 (0x267), region = 32  ;;  %p196_p4 = scmp.lt.s32.totalorder (!%p162_p3), %s492_s16, 7  ;;  %510 = vmatprep.mubr.bf16.mxu0 (!%p162_p3), %v546_v0  ;;  %vm321_vm3 = vcmask (!%p162_p3), 261312   ;;  %vm325_vm4 = vcmask (!%p162_p3), 253952  }
   0x8   : > { %v297_v12 = vand.u32 (!%p162_p3), 127, %v296_v11  ;;  %v299_v13 = vshrl.u32 (!%p162_p3), %v296_v11, 7  ;;  %s324_s25 = scalar_lea.vmem (!%p162_p3), [#allocation2], %s562_s12  ;;  %p497_p5 = scmp.ne.s32.totalorder (!%p162_p3), %s562_s12, 3 }
   0xa   : > { %v302_v14 = vadd.s32 (!%p162_p3), 4294967288, %v297_v12  ;;  %v309_v15 = vadd.s32 (!%p162_p3), 4294967280, %v297_v12  ;;  %v316_v17 = vadd.s32 (!%p162_p3), 4294967272, %v297_v12  ;;  %v300_v19 = vsub.s32 (!%p162_p3), %v297_v12, %v299_v13 }
   0xc   : > { %v305_v20 = vsub.s32 (!%p162_p3), %v302_v14, %v299_v13  ;;  %v312_v21 = vsub.s32 (!%p162_p3), %v309_v15, %v299_v13  ;;  %v319_v22 = vsub.s32 (!%p162_p3), %v316_v17, %v299_v13 }
   0xe   : > { %s650_s16 = smov (!%p196_p4, %s492_s16), 7  ;;  %vm333_vm5 = vcmask (!%p497_p5), 261120   ;;  %v572_v33 = vmov (!%p497_p5), 0.0   ;;  %vm573_vm6 = vmmov (!%p497_p5), 0   ;;  %v331_v34 = vld [vmem:[%s641_s0] sm:$0xf] (!%p497_p5) }
   0xf   : > { %s493_s19 = sshll.u32 %s650_s16, 2  ;;  %vm410_vm7 = vcmask (!%p497_p5), 27648  }
  0x10   : > { %s199_s22 = scalar_lea.vmem %s643_s2, %s493_s19 }
  0x11   : > { %v545_v1 = vld [vmem:[%s199_s22] sm:$0xff]  }
  0x12   : > { %508 = vmatprep.subr.bf16.mxu0 %v545_v1 }
  0x13   : > { %509 = vmatpush3.bf16.xpose.msra.mxu0 %v545_v1 }
  0x14   : > { %514 = vmatprep.subr.mxu0 (!%p497_p5), %v572_v33 }
  0x1a   : > { %511 = vmatmul.mubr.bf16.vlgmr.msra.gmra.mrb[0].mxu0 %v547_v2 }
  0x1b   : > { %516 = vmatprep.mubr.msk.f32.mxu0 (!%p497_p5), %vm573_vm6, %v572_v33 }
  0xed   : > { %v512_v3 = vpop.f32.mrb[0].mxu0 }
  0xee   : > { %v264_v4 = vpop.f32.mrb[1].mxu0  ;;  %v286_v5 = vsel %vm279_vm0, %v512_v3, -inf }
  0xef   : > { %287 = vmax.xlane.f32.xlu1 %v286_v5  ;;  %v513_v6 = vpop.f32.mrb[2].mxu0  ;;  %v280_v7 = vsel %vm279_vm0, %v264_v4, -inf }
  0xf0   : > { %281 = vmax.xlane.f32.xlu0 %v280_v7  ;;  %v267_v8 = vpop.f32.mrb[3].mxu0  ;;  %v289_v9 = vsel %vm279_vm0, %v513_v6, -inf }
  0xf1   : > { %v283_v10 = vsel %vm279_vm0, %v267_v8, -inf }
  0xf3   : > { %290 = vmax.xlane.f32.xlu1 %v289_v9 }
  0xf4   : > { %284 = vmax.xlane.f32.xlu0 %v283_v10 }
 0x17c   : > { %v288_v16 = vpop.xlane.xlu1 %287 }
 0x17d   : > { %v282_v18 = vpop.xlane.xlu0 %281  ;;  %v313_v27 = vrot.slane %v288_v16, %v312_v21 }
 0x17e   : > { %v301_v25 = vrot.slane %v282_v18, %v300_v19 }
 0x180   : > { %v291_v23 = vpop.xlane.xlu1 %290 }
 0x181   : > { %v285_v24 = vpop.xlane.xlu0 %284  ;;  %v320_v28 = vrot.slane %v291_v23, %v319_v22  ;;  %330 = sbr.rel (%p497_p5) target bundleno = 615 (0x267), region = 36 }
 0x182   : > { %v306_v26 = vrot.slane %v285_v24, %v305_v20 }
 0x184   : > { %v308_v29 = vsel %vm307_vm1, %v306_v26, %v301_v25 }
 0x185   : > { %v315_v30 = vsel %vm314_vm2, %v313_v27, %v308_v29 }
 0x186   : > { %v322_v31 = vsel %vm321_vm3, %v320_v28, %v315_v30 }
 0x187   : > { %326 = vst.msk [vmem:[%s324_s25] sm:$0x1] %vm325_vm4, %v322_v31 }
 0x18e   : > { %v332_v32 = vld [vmem:[#allocation2] sm:$0xf] }
 0x18f   : > { %515 = vmatpush3.xpose.msk.msra.mxu0 %vm333_vm5, %v332_v32 }
 0x192   : > { %517 = vmatmul.mubr.msk.f32.vlgmr.msra.gmra.mrb[0].mxu0 %vm333_vm5, %v331_v34 }
 0x265   : > { %v406_v35 = vpop.f32.mrb[0].mxu0 }
 0x266   : > { %411 = vst.msk [vmem:[%s644_s3] sm:$0xf] %vm410_vm7, %v406_v35  ;;  %v518_v36 = vpop.f32.mrb[1].mxu0 }
 0x267 PF: > { %s13_s14 = sadd.s32 1, %s570_s14   ;;  %s645_s12 = smov %s566_s13 }
 0x268   : > { %p10_p6 = scmp.ge.s32.totalorder %s13_s14, 6   ;;  %s646_s13 = smov %s648_s15 }
 0x26a   :  { %12 = sbr.rel (!%p10_p6) target bundleno = 2 (0x2), region = 70 }

</bundles_post_ra>
